<compile_context>
chip_gen: v7x
topology: tpu7x:2x2x1
jax: 0.10.0
libtpu: 0.0.40
codegen_flags: <defaults>
</compile_context>

<pallas_src>
import jax
import jax.numpy as jnp
from jax.experimental import pallas as pl
from jax.experimental.pallas import tpu as pltpu


def se_gate_kernel(s_ref, w_ref, b_ref, x_ref, o_ref):
    # Per-block gate: VPU broadcast-multiply + lane reduction over C_in (=22).
    # This avoids MXU warm-up / result-FIFO latency for a negligible-FLOP matvec.
    w = w_ref[...].astype(jnp.float32)                       # [tc, C_in]
    s = s_ref[...].astype(jnp.float32)                       # [1,  C_in]
    gate = jnp.sum(w * s, axis=1, keepdims=True)             # [tc, 1]
    gate = jax.nn.sigmoid(gate + b_ref[...].astype(jnp.float32))
    # Broadcast the per-channel gate across the H*W lane axis.
    o_ref[...] = (x_ref[...].astype(jnp.float32) * gate).astype(o_ref.dtype)


def se_gate(x142, x139, weight, bias):
    """x142: [1, C_in, 1, 1], x139: [1, C_out, H, W] (NCHW).  Returns NCHW."""
    n, c_in, _, _ = x142.shape
    _, c_out, h, w = x139.shape
    assert n == 1

    hw = h * w
    s = x142.reshape(1, c_in)              # [1, C_in]
    wmat = weight.reshape(c_out, c_in)     # [C_out, C_in]  (no transpose)
    b = bias.reshape(c_out, 1)             # [C_out, 1]
    x_chw = x139.reshape(c_out, hw)        # [C_out, H*W]   (free view)

    # Split C_out into 2 blocks when the block stays sublane-aligned (mult of 8):
    # enables DMA/compute overlap and dual-TC use on v7x; stays at 1 otherwise.
    nblk = 2 if (c_out % 2 == 0 and (c_out // 2) % 8 == 0) else 1
    tc = c_out // nblk

    out_chw = pl.pallas_call(
        se_gate_kernel,
        out_shape=jax.ShapeDtypeStruct((c_out, hw), x139.dtype),
        grid=(nblk,),
        in_specs=[
            pl.BlockSpec((1, c_in), lambda i: (0, 0)),       # squeeze vector
            pl.BlockSpec((tc, c_in), lambda i: (i, 0)),      # weight slice
            pl.BlockSpec((tc, 1), lambda i: (i, 0)),         # bias slice
            pl.BlockSpec((tc, hw), lambda i: (i, 0)),        # feature rows
        ],
        out_specs=pl.BlockSpec((tc, hw), lambda i: (i, 0)),
        compiler_params=pltpu.CompilerParams(
            dimension_semantics=("parallel",)),
    )(s, wmat, b, x_chw)

    return out_chw.reshape(1, c_out, h, w)  # free view, no transpose


def reference(x142, x139, weight, bias):
    s = x142.reshape(1, -1)                          # [1, C_in]
    wmat = weight.reshape(weight.shape[0], -1)       # [C_out, C_in]
    gate = jax.nn.sigmoid(s @ wmat.T + bias[None, :])  # [1, C_out]
    return x139 * gate[:, :, None, None]


if __name__ == "__main__":
    key = jax.random.PRNGKey(0)
    k1, k2, k3, k4 = jax.random.split(key, 4)

    # Shapes implied by the module's forward pass.
    C_IN, C_OUT, H, W = 22, 528, 14, 14
    x142 = jax.random.normal(k1, (1, C_IN, 1, 1), dtype=jnp.float32)
    x139 = jax.random.normal(k2, (1, C_OUT, H, W), dtype=jnp.float32)
    # Deterministic synthetic Conv2d(22, 528, kernel_size=1) parameters.
    weight = jax.random.normal(k3, (C_OUT, C_IN, 1, 1), dtype=jnp.float32) * 0.05
    bias = jax.random.normal(k4, (C_OUT,), dtype=jnp.float32) * 0.05

    out = se_gate(x142, x139, weight, bias)
    out = jax.block_until_ready(out)

    ref = reference(x142, x139, weight, bias)
    assert out.shape == (1, C_OUT, H, W)
    assert jnp.allclose(out, ref, atol=1e-5, rtol=1e-5), "mismatch vs reference"

    print("KERNEL_OK")
</pallas_src>

<mosaic_0001>
module attributes {stable_mosaic.version = 11 : i64} {
  func.func @se_gate_kernel(%arg0: i32, %arg1: memref<1x22xf32, #tpu.memory_space<vmem>>, %arg2: memref<264x22xf32, #tpu.memory_space<vmem>>, %arg3: memref<264x1xf32, #tpu.memory_space<vmem>>, %arg4: memref<264x196xf32, #tpu.memory_space<vmem>>, %arg5: memref<264x196xf32, #tpu.memory_space<vmem>>) attributes {dimension_semantics = [#tpu.dimension_semantics<parallel>], iteration_bounds = array<i64: 2>, scalar_prefetch = 0 : i64, scratch_operands = 0 : i64, tpu.core_type = #tpu.core_type<tc>, window_params = [{pipeline_mode = #tpu.pipeline_mode<synchronous>, transform_indices = @transform_0, window_bounds = array<i64: 1, 22>}, {transform_indices = @transform_1, window_bounds = array<i64: 264, 22>}, {transform_indices = @transform_2, window_bounds = array<i64: 264, 1>}, {transform_indices = @transform_3, window_bounds = array<i64: 264, 196>}, {transform_indices = @transform_4, window_bounds = array<i64: 264, 196>}]} {
    %c0 = arith.constant 0 : index
    %c0_0 = arith.constant 0 : index
    %0 = vector.load %arg2[%c0, %c0_0] : memref<264x22xf32, #tpu.memory_space<vmem>>, vector<264x22xf32>
    %c0_1 = arith.constant 0 : index
    %c0_2 = arith.constant 0 : index
    %1 = vector.load %arg1[%c0_1, %c0_2] : memref<1x22xf32, #tpu.memory_space<vmem>>, vector<1x22xf32>
    %2 = vector.broadcast %1 : vector<1x22xf32> to vector<264x22xf32>
    %3 = arith.mulf %0, %2 : vector<264x22xf32>
    %cst = arith.constant dense<0.000000e+00> : vector<264xf32>
    %4 = vector.multi_reduction <add>, %3, %cst [1] : vector<264x22xf32> to vector<264xf32>
    %5 = vector.shape_cast %4 : vector<264xf32> to vector<264x1xf32>
    %c0_3 = arith.constant 0 : index
    %c0_4 = arith.constant 0 : index
    %6 = vector.load %arg3[%c0_3, %c0_4] : memref<264x1xf32, #tpu.memory_space<vmem>>, vector<264x1xf32>
    %7 = arith.addf %5, %6 : vector<264x1xf32>
    %8 = arith.negf %7 : vector<264x1xf32>
    %9 = math.exp %8 : vector<264x1xf32>
    %cst_5 = arith.constant 1.000000e+00 : f32
    %10 = vector.broadcast %cst_5 : f32 to vector<264x1xf32>
    %11 = arith.addf %10, %9 : vector<264x1xf32>
    %12 = arith.divf %10, %11 : vector<264x1xf32>
    %c0_6 = arith.constant 0 : index
    %c0_7 = arith.constant 0 : index
    %13 = vector.load %arg4[%c0_6, %c0_7] : memref<264x196xf32, #tpu.memory_space<vmem>>, vector<264x196xf32>
    %14 = vector.broadcast %12 : vector<264x1xf32> to vector<264x196xf32>
    %15 = arith.mulf %13, %14 : vector<264x196xf32>
    %c0_8 = arith.constant 0 : index
    %c0_9 = arith.constant 0 : index
    %16 = vector.load %arg5[%c0_8, %c0_9] : memref<264x196xf32, #tpu.memory_space<vmem>>, vector<264x196xf32>
    tpu.vector_store %arg5[%c0_8, %c0_9], %15 {strides = array<i32>} : memref<264x196xf32, #tpu.memory_space<vmem>>, vector<264x196xf32>,
    return
  }
  func.func @transform_0(%arg0: i32) -> (i32, i32) {
    %c0_i32 = arith.constant 0 : i32
    %c0_i32_0 = arith.constant 0 : i32
    %c0_i32_1 = arith.constant 0 : i32
    return %c0_i32, %c0_i32_0 : i32, i32
  }
  func.func @transform_1(%arg0: i32) -> (i32, i32) {
    %c0_i32 = arith.constant 0 : i32
    %c0_i32_0 = arith.constant 0 : i32
    return %arg0, %c0_i32 : i32, i32
  }
  func.func @transform_2(%arg0: i32) -> (i32, i32) {
    %c0_i32 = arith.constant 0 : i32
    %c0_i32_0 = arith.constant 0 : i32
    return %arg0, %c0_i32 : i32, i32
  }
  func.func @transform_3(%arg0: i32) -> (i32, i32) {
    %c0_i32 = arith.constant 0 : i32
    %c0_i32_0 = arith.constant 0 : i32
    return %arg0, %c0_i32 : i32, i32
  }
  func.func @transform_4(%arg0: i32) -> (i32, i32) {
    %c0_i32 = arith.constant 0 : i32
    %c0_i32_0 = arith.constant 0 : i32
    return %arg0, %c0_i32 : i32, i32
  }
}

</mosaic_0001>

<bundles_post_ra>
// kernel: tpu_custom_call.1
= control target key start
LH: loop header
LB: loop body
LE: loop exit
PB: predicated region body
PF: predicated region fallthrough
CT: control target
= control target key end

     0   :  { %s1359_s15 = smov 0   ;;  %s1703_s0 = inlined_call_operand.vmem [shape: f32[1,22], index: 0, kind: input, shape index: {}]   ;;  %s1704_s1 = inlined_call_operand.vmem [shape: f32[528,22], index: 1, kind: input, shape index: {}]   ;;  %s1705_s2 = inlined_call_operand.vmem [shape: f32[528,1], index: 2, kind: input, shape index: {}]   ;;  %s1706_s3 = inlined_call_operand.vmem [shape: f32[528,196], index: 3, kind: input, shape index: {}]   ;;  %s1707_s4 = inlined_call_operand.vmem [shape: f32[528,196], index: 4, kind: output, shape index: {}]  }
   0x1 LB: > { %s1133_s16 = sadd.s32 4294967295, %s1331_s15   ;;  %p1137_p0 = scmp.ge.s32.totalorder %s1331_s15, 1  ;;  %s1331_s15 = sphi %s1359_s15, %s14_s15  }
   0x2   : > { %p186_p1 = scmp.lt.s32.totalorder %s1331_s15, 3 }
   0x4   : > { %p187_p2 = pnand %p1137_p0, %p186_p1 }
   0x5   : > { %s224_s17 = smul.u32 (!%p187_p2), 33, %s1133_s16  ;;  %v1373_v0 = vld [vmem:[%s1703_s0] ss:$0 sm:$0xff] (!%p187_p2)  ;;  %vm323_vm0 = vcmask (!%p187_p2), 179200   ;;  %vm985_vm1 = vcmask (!%p187_p2), 556032  }
   0x6   : > { %190 = sbr.rel (%p187_p2) target bundleno = 397 (0x18d), region = 36 }
   0x7   : > { %p225_p3 = scmp.lt.s32.totalorder (!%p187_p2), %s224_s17, 65 }
   0xd   : > { %s1709_s17 = smov (!%p225_p3, %s224_s17), 65 }
   0xe   : > { %s1138_s18 = sshll.u32 %s1709_s17, 3  ;;  %s1180_s27 = sshll.u32 %s1709_s17, 4 }
   0xf   : > { %s1380_s23 = scalar_lea.vmem %s1704_s1, %s1138_s18  ;;  %s1489_s26 = scalar_lea.vmem %s1705_s2, %s1138_s18 }
  0x10   : > { %v250_v1 = vld [vmem:[%s1380_s23] sm:$0xff]  ;;  %v252_v2 = vld [vmem:[%s1380_s23 + $0x10] sm:$0xff]  ;;  %v251_v3 = vld [vmem:[%s1380_s23 + $0x8] sm:$0xff]  ;;  %s1528_s30 = scalar_lea.vmem %s1706_s3, %s1180_s27  ;;  %s1535_s7 = scalar_lea.vmem %s1707_s4, %s1180_s27 }
  0x11   : > { %v290_v4 = vmul.f32 %v1373_v0, %v250_v1  ;;  %v292_v5 = vmul.f32 %v1373_v0, %v252_v2  ;;  %v291_v6 = vmul.f32 %v1373_v0, %v251_v3  ;;  %v253_v7 = vld [vmem:[%s1380_s23 + $0x18] sm:$0xff]  ;;  %v254_v9 = vld [vmem:[%s1380_s23 + $0x20] sm:$0xff]  ;;  %v255_v10 = vld [vmem:[%s1380_s23 + $0x28] sm:$0xff] }
  0x12   : > { %v293_v8 = vmul.f32 %v1373_v0, %v253_v7  ;;  %v294_v15 = vmul.f32 %v1373_v0, %v254_v9  ;;  %v295_v16 = vmul.f32 %v1373_v0, %v255_v10  ;;  %v256_v17 = vld [vmem:[%s1380_s23 + $0x30] sm:$0xff]  ;;  %v257_v18 = vld [vmem:[%s1380_s23 + $0x38] sm:$0xff]  ;;  %v258_v23 = vld [vmem:[%s1380_s23 + $0x40] sm:$0xff] }
  0x13   : > { %v324_v11 = vsel %vm323_vm0, %v290_v4, 0.0  ;;  %v330_v12 = vsel %vm323_vm0, %v292_v5, 0.0  ;;  %v327_v13 = vsel %vm323_vm0, %v291_v6, 0.0  ;;  %v296_v20 = vmul.f32 %v1373_v0, %v256_v17  ;;  %v259_v24 = vld [vmem:[%s1380_s23 + $0x48] sm:$0xff]  ;;  %v282_v25 = vld [vmem:[%s1380_s23 + $0x100] sm:$0xff]  ;;  %v260_v30 = vld [vmem:[%s1380_s23 + $0x50] sm:$0xff] }
  0x14   : > { %325 = vadd.xlane.f32.xlu0 %v324_v11  ;;  %331 = vadd.xlane.f32.xlu1 %v330_v12  ;;  %v333_v14 = vsel %vm323_vm0, %v293_v8, 0.0  ;;  %v336_v19 = vsel %vm323_vm0, %v294_v15, 0.0  ;;  %v339_v21 = vsel %vm323_vm0, %v295_v16, 0.0  ;;  %v297_v22 = vmul.f32 %v1373_v0, %v257_v18  ;;  %v261_v31 = vld [vmem:[%s1380_s23 + $0x58] sm:$0xff]  ;;  %v262_v38 = vld [vmem:[%s1380_s23 + $0x60] sm:$0xff]  ;;  %v263_v39 = vld [vmem:[%s1380_s23 + $0x68] sm:$0xff] }
  0x15   : > { %v342_v26 = vsel %vm323_vm0, %v296_v20, 0.0  ;;  %v298_v27 = vmul.f32 %v1373_v0, %v258_v23  ;;  %v299_v29 = vmul.f32 %v1373_v0, %v259_v24  ;;  %v322_v32 = vmul.f32 %v1373_v0, %v282_v25  ;;  %v264_v44 = vld [vmem:[%s1380_s23 + $0x70] sm:$0xff]  ;;  %v265_v45 = vld [vmem:[%s1380_s23 + $0x78] sm:$0xff]  ;;  %v266_v50 = vld [vmem:[%s1380_s23 + $0x80] sm:$0xff] }
  0x16   : > { %v345_v28 = vsel %vm323_vm0, %v297_v22, 0.0  ;;  %v300_v35 = vmul.f32 %v1373_v0, %v260_v30  ;;  %v301_v37 = vmul.f32 %v1373_v0, %v261_v31  ;;  %v302_v41 = vmul.f32 %v1373_v0, %v262_v38  ;;  %v267_v51 = vld [vmem:[%s1380_s23 + $0x88] sm:$0xff]  ;;  %v268_v56 = vld [vmem:[%s1380_s23 + $0x90] sm:$0xff]  ;;  %v269_v57 = vld [vmem:[%s1380_s23 + $0x98] sm:$0xff] }
  0x17   : > { %v1415_v33 = vsel %vm323_vm0, %v322_v32, 0.0  ;;  %v348_v34 = vsel %vm323_vm0, %v298_v27, 0.0  ;;  %v351_v36 = vsel %vm323_vm0, %v299_v29, 0.0  ;;  %v303_v43 = vmul.f32 %v1373_v0, %v263_v39  ;;  %v270_v62 = vld [vmem:[%s1380_s23 + $0xa0] sm:$0xff]  ;;  %v271_v63 = vld [vmem:[%s1380_s23 + $0xa8] sm:$0xff]  ;;  %v272_v5 = vld [vmem:[%s1380_s23 + $0xb0] sm:$0xff] }
  0x18   : > { %328 = vadd.xlane.f32.xlu0 %v327_v13  ;;  %334 = vadd.xlane.f32.xlu1 %v333_v14  ;;  %v354_v40 = vsel %vm323_vm0, %v300_v35, 0.0  ;;  %v357_v42 = vsel %vm323_vm0, %v301_v37, 0.0  ;;  %v360_v46 = vsel %vm323_vm0, %v302_v41, 0.0  ;;  %v304_v47 = vmul.f32 %v1373_v0, %v264_v44  ;;  %v273_v6 = vld [vmem:[%s1380_s23 + $0xb8] sm:$0xff]  ;;  %v274_v11 = vld [vmem:[%s1380_s23 + $0xc0] sm:$0xff]  ;;  %v275_v12 = vld [vmem:[%s1380_s23 + $0xc8] sm:$0xff] }
  0x19   : > { %v363_v48 = vsel %vm323_vm0, %v303_v43, 0.0  ;;  %v305_v49 = vmul.f32 %v1373_v0, %v265_v45  ;;  %v306_v53 = vmul.f32 %v1373_v0, %v266_v50  ;;  %v307_v55 = vmul.f32 %v1373_v0, %v267_v51  ;;  %v276_v18 = vld [vmem:[%s1380_s23 + $0xd0] sm:$0xff]  ;;  %v278_v24 = vld [vmem:[%s1380_s23 + $0xe0] sm:$0xff]  ;;  %v279_v25 = vld [vmem:[%s1380_s23 + $0xe8] sm:$0xff] }
  0x1a   : > { %v366_v52 = vsel %vm323_vm0, %v304_v47, 0.0  ;;  %v308_v59 = vmul.f32 %v1373_v0, %v268_v56  ;;  %v309_v61 = vmul.f32 %v1373_v0, %v269_v57  ;;  %v310_v2 = vmul.f32 %v1373_v0, %v270_v62  ;;  %v280_v30 = vld [vmem:[%s1380_s23 + $0xf0] sm:$0xff]  ;;  %v281_v31 = vld [vmem:[%s1380_s23 + $0xf8] sm:$0xff]  ;;  %v424_v44 = vld [vmem:[%s1489_s26 + $0x8] sm:$0xff] }
  0x1b   : > { %v369_v54 = vsel %vm323_vm0, %v305_v49, 0.0  ;;  %v372_v58 = vsel %vm323_vm0, %v306_v53, 0.0  ;;  %v375_v60 = vsel %vm323_vm0, %v307_v55, 0.0  ;;  %v311_v4 = vmul.f32 %v1373_v0, %v271_v63  ;;  %v425_v39 = vld [vmem:[%s1489_s26 + $0x10] sm:$0xff]  ;;  %v427_v51 = vld [vmem:[%s1489_s26 + $0x20] sm:$0xff]  ;;  %v430_v63 = vld [vmem:[%s1489_s26 + $0x38] sm:$0xff] }
  0x1c   : > { %337 = vadd.xlane.f32.xlu0 %v336_v19  ;;  %340 = vadd.xlane.f32.xlu1 %v339_v21  ;;  %v378_v1 = vsel %vm323_vm0, %v308_v59, 0.0  ;;  %v381_v3 = vsel %vm323_vm0, %v309_v61, 0.0  ;;  %v384_v7 = vsel %vm323_vm0, %v310_v2, 0.0  ;;  %v312_v8 = vmul.f32 %v1373_v0, %v272_v5  ;;  %v277_v19 = vld [vmem:[%s1380_s23 + $0xd8] sm:$0xff]  ;;  %v429_v59 = vld [vmem:[%s1489_s26 + $0x30] sm:$0xff]  ;;  %v431_v5 = vld [vmem:[%s1489_s26 + $0x40] sm:$0xff] }
  0x1d   : > { %v387_v9 = vsel %vm323_vm0, %v311_v4, 0.0  ;;  %v313_v10 = vmul.f32 %v1373_v0, %v273_v6  ;;  %v314_v14 = vmul.f32 %v1373_v0, %v274_v11  ;;  %v315_v16 = vmul.f32 %v1373_v0, %v275_v12 }
  0x1e   : > { %v390_v13 = vsel %vm323_vm0, %v312_v8, 0.0  ;;  %v1333_v17 = vmov 0   ;;  %v316_v21 = vmul.f32 %v1373_v0, %v276_v18  ;;  %v317_v23 = vmul.f32 %v1373_v0, %v277_v19 }
  0x1f   : > { %v393_v15 = vsel %vm323_vm0, %v313_v10, 0.0  ;;  %1191 = vset.pattern.permute.xlu1 %v1333_v17  ;;  %1192 = vset.pattern.permute.xlu0 %v1333_v17  ;;  %v396_v20 = vsel %vm323_vm0, %v314_v14, 0.0  ;;  %v399_v22 = vsel %vm323_vm0, %v315_v16, 0.0  ;;  %v318_v27 = vmul.f32 %v1373_v0, %v278_v24  ;;  %v432_v10 = vld [vmem:[%s1489_s26 + $0x48] sm:$0xff]  ;;  %v433_v14 = vld [vmem:[%s1489_s26 + $0x50] sm:$0xff]  ;;  %v434_v24 = vld [vmem:[%s1489_s26 + $0x58] sm:$0xff] }
  0x20   : > { %343 = vadd.xlane.f32.xlu0 %v342_v26  ;;  %346 = vadd.xlane.f32.xlu1 %v345_v28  ;;  %v402_v26 = vsel %vm323_vm0, %v316_v21, 0.0  ;;  %v405_v28 = vsel %vm323_vm0, %v317_v23, 0.0  ;;  %v319_v29 = vmul.f32 %v1373_v0, %v279_v25 }
  0x21   : > { %v408_v32 = vsel %vm323_vm0, %v318_v27, 0.0 }
  0x22   : > { %v411_v35 = vsel %vm323_vm0, %v319_v29, 0.0 }
  0x24   : > { %349 = vadd.xlane.f32.xlu0 %v348_v34  ;;  %352 = vadd.xlane.f32.xlu1 %v351_v36  ;;  %v320_v34 = vmul.f32 %v1373_v0, %v280_v30  ;;  %v321_v36 = vmul.f32 %v1373_v0, %v281_v31  ;;  %v423_v0 = vld [vmem:[%s1489_s26] sm:$0xff] }
  0x26   : > { %v414_v37 = vsel %vm323_vm0, %v320_v34, 0.0  ;;  %v417_v38 = vsel %vm323_vm0, %v321_v36, 0.0 }
  0x28   : > { %355 = vadd.xlane.f32.xlu0 %v354_v40  ;;  %358 = vadd.xlane.f32.xlu1 %v357_v42 }
  0x2c   : > { %361 = vadd.xlane.f32.xlu0 %v360_v46  ;;  %364 = vadd.xlane.f32.xlu1 %v363_v48 }
  0x30   : > { %367 = vadd.xlane.f32.xlu0 %v366_v52  ;;  %370 = vadd.xlane.f32.xlu1 %v369_v54  ;;  %v428_v52 = vld [vmem:[%s1489_s26 + $0x28] sm:$0xff] }
  0x34   : > { %373 = vadd.xlane.f32.xlu0 %v372_v58  ;;  %376 = vadd.xlane.f32.xlu1 %v375_v60 }
  0x38   : > { %379 = vadd.xlane.f32.xlu0 %v378_v1  ;;  %382 = vadd.xlane.f32.xlu1 %v381_v3 }
  0x3c   : > { %385 = vadd.xlane.f32.xlu0 %v384_v7  ;;  %388 = vadd.xlane.f32.xlu1 %v387_v9 }
  0x40   : > { %391 = vadd.xlane.f32.xlu0 %v390_v13  ;;  %394 = vadd.xlane.f32.xlu1 %v393_v15 }
  0x44   : > { %397 = vadd.xlane.f32.xlu0 %v396_v20  ;;  %400 = vadd.xlane.f32.xlu1 %v399_v22 }
  0x48   : > { %403 = vadd.xlane.f32.xlu0 %v402_v26  ;;  %406 = vadd.xlane.f32.xlu1 %v405_v28  ;;  %v435_v26 = vld [vmem:[%s1489_s26 + $0x60] sm:$0xff] }
  0x4c   : > { %409 = vadd.xlane.f32.xlu0 %v408_v32  ;;  %412 = vadd.xlane.f32.xlu1 %v411_v35 }
  0x50   : > { %415 = vadd.xlane.f32.xlu0 %v414_v37  ;;  %418 = vadd.xlane.f32.xlu1 %v417_v38  ;;  %v436_v37 = vld [vmem:[%s1489_s26 + $0x68] sm:$0xff]  ;;  %v437_v38 = vld [vmem:[%s1489_s26 + $0x70] sm:$0xff] }
  0x54   : > { %421 = vadd.xlane.f32.xlu0 %v1415_v33  ;;  %v426_v33 = vld [vmem:[%s1489_s26 + $0x18] sm:$0xff] }
  0xa1   : > { %v326_v40 = vpop.xlane.xlu0 %325  ;;  %v332_v41 = vpop.xlane.xlu1 %331 }
  0xa2   : > { %v456_v42 = vadd.f32 %v423_v0, %v326_v40  ;;  %v458_v43 = vadd.f32 %v425_v39, %v332_v41 }
  0xa4   : > { %v1145_v45 = vmul.f32 -1.442695, %v456_v42  ;;  %v1147_v46 = vmul.f32 -1.442695, %v458_v43 }
  0xa5   : > { %v329_v47 = vpop.xlane.xlu0 %328  ;;  %v335_v48 = vpop.xlane.xlu1 %334 }
  0xa6   : > { %1193 = vpow2.f32 %v1145_v45  ;;  %v457_v49 = vadd.f32 %v424_v44, %v329_v47  ;;  %v459_v50 = vadd.f32 %v426_v33, %v335_v48  ;;  %v439_v48 = vld [vmem:[%s1489_s26 + $0x80] sm:$0xff] }
  0xa7   : > { %1195 = vpow2.f32 %v1147_v46 }
  0xa8   : > { %v1146_v53 = vmul.f32 -1.442695, %v457_v49  ;;  %v1148_v54 = vmul.f32 -1.442695, %v459_v50  ;;  %v438_v49 = vld [vmem:[%s1489_s26 + $0x78] sm:$0xff] }
  0xa9   : > { %v338_v55 = vpop.xlane.xlu0 %337  ;;  %v341_v56 = vpop.xlane.xlu1 %340 }
  0xaa   : > { %1197 = vpow2.f32 %v1146_v53  ;;  %v460_v57 = vadd.f32 %v427_v51, %v338_v55  ;;  %v461_v58 = vadd.f32 %v428_v52, %v341_v56 }
  0xab   : > { %1199 = vpow2.f32 %v1148_v54 }
  0xac   : > { %v1149_v60 = vmul.f32 -1.442695, %v460_v57  ;;  %v1150_v61 = vmul.f32 -1.442695, %v461_v58 }
  0xad   : > { %v344_v62 = vpop.xlane.xlu0 %343  ;;  %v347_v1 = vpop.xlane.xlu1 %346 }
  0xae   : > { %1201 = vpow2.f32 %v1149_v60  ;;  %v462_v2 = vadd.f32 %v429_v59, %v344_v62  ;;  %v463_v6 = vadd.f32 %v430_v63, %v347_v1  ;;  %v441_v59 = vld [vmem:[%s1489_s26 + $0x90] sm:$0xff] }
  0xaf   : > { %1203 = vpow2.f32 %v1150_v61 }
  0xb0   : > { %v1194_v3 = vpop.eup %1193  ;;  %v1151_v4 = vmul.f32 -1.442695, %v462_v2  ;;  %v1152_v16 = vmul.f32 -1.442695, %v463_v6 }
  0xb1   : > { %v1196_v7 = vpop.eup %1195  ;;  %v588_v8 = vadd.f32 1.0, %v1194_v3  ;;  %v350_v9 = vpop.xlane.xlu0 %349  ;;  %v440_v3 = vld [vmem:[%s1489_s26 + $0x88] sm:$0xff] }
  0xb2   : > { %v353_v11 = vpop.xlane.xlu1 %352  ;;  %v590_v12 = vadd.f32 1.0, %v1196_v7  ;;  %1205 = vpow2.f32 %v1151_v4  ;;  %v464_v13 = vadd.f32 %v431_v5, %v350_v9  ;;  %v443_v9 = vld [vmem:[%s1489_s26 + $0xa0] sm:$0xff] }
  0xb3   : > { %1207 = vrcp.f32 %v588_v8  ;;  %v465_v17 = vadd.f32 %v432_v10, %v353_v11 }
  0xb4   : > { %v1198_v15 = vpop.eup %1197  ;;  %1209 = vrcp.f32 %v590_v12  ;;  %v1153_v25 = vmul.f32 -1.442695, %v464_v13 }
  0xb5   : > { %v1200_v18 = vpop.eup %1199  ;;  %v589_v19 = vadd.f32 1.0, %v1198_v15  ;;  %v356_v20 = vpop.xlane.xlu0 %355  ;;  %v1154_v29 = vmul.f32 -1.442695, %v465_v17 }
  0xb6   : > { %v359_v21 = vpop.xlane.xlu1 %358  ;;  %v591_v22 = vadd.f32 1.0, %v1200_v18  ;;  %v466_v23 = vadd.f32 %v433_v14, %v356_v20 }
  0xb7   : > { %1211 = vrcp.f32 %v589_v19  ;;  %v467_v34 = vadd.f32 %v434_v24, %v359_v21 }
  0xb8   : > { %v1202_v27 = vpop.eup %1201  ;;  %v1155_v28 = vmul.f32 -1.442695, %v466_v23  ;;  %1213 = vpow2.f32 %v1152_v16  ;;  %v442_v16 = vld [vmem:[%s1489_s26 + $0x98] sm:$0xff] }
  0xb9   : > { %v1204_v30 = vpop.eup %1203  ;;  %1215 = vrcp.f32 %v591_v22  ;;  %v592_v31 = vadd.f32 1.0, %v1202_v27  ;;  %v362_v32 = vpop.xlane.xlu0 %361  ;;  %v1156_v43 = vmul.f32 -1.442695, %v467_v34  ;;  %v445_v22 = vld [vmem:[%s1489_s26 + $0xb0] sm:$0xff] }
  0xba   : > { %v365_v35 = vpop.xlane.xlu1 %364  ;;  %1217 = vpow2.f32 %v1155_v28  ;;  %v468_v36 = vadd.f32 %v435_v26, %v362_v32  ;;  %v593_v39 = vadd.f32 1.0, %v1204_v30  ;;  %v444_v28 = vld [vmem:[%s1489_s26 + $0xa8] sm:$0xff] }
  0xbb   : > { %1219 = vpow2.f32 %v1153_v25  ;;  %v469_v44 = vadd.f32 %v436_v37, %v365_v35 }
  0xbc   : > { %v1206_v0 = vpop.eup %1205  ;;  %v1157_v40 = vmul.f32 -1.442695, %v468_v36  ;;  %1221 = vpow2.f32 %v1154_v29  ;;  %v447_v36 = vld [vmem:[%s1489_s26 + $0xc0] sm:$0xff] }
  0xbd   : > { %v1208_v41 = vpop.eup %1207  ;;  %1223 = vrcp.f32 %v592_v31  ;;  %v368_v42 = vpop.xlane.xlu0 %367  ;;  %v594_v47 = vadd.f32 1.0, %v1206_v0  ;;  %v1158_v53 = vmul.f32 -1.442695, %v469_v44 }
  0xbe   : > { %v371_v33 = vpop.xlane.xlu1 %370  ;;  %1225 = vpow2.f32 %v1157_v40  ;;  %v470_v45 = vadd.f32 %v437_v38, %v368_v42  ;;  %755 = vperm.xlu1 %1191, %v1208_v41   ;;  %v1210_v46 = vpop.eup %1209  ;;  %v446_v41 = vld [vmem:[%s1489_s26 + $0xb8] sm:$0xff] }
  0xbf   : > { %1227 = vrcp.f32 %v593_v39  ;;  %v471_v57 = vadd.f32 %v438_v49, %v371_v33 }
  0xc0   : > { %v1159_v50 = vmul.f32 -1.442695, %v470_v45  ;;  %1229 = vpow2.f32 %v1156_v43 }
  0xc1   : > { %v1212_v51 = vpop.eup %1211  ;;  %v374_v52 = vpop.xlane.xlu0 %373  ;;  %1231 = vrcp.f32 %v594_v47  ;;  %v1160_v7 = vmul.f32 -1.442695, %v471_v57  ;;  %v449_v47 = vld [vmem:[%s1489_s26 + $0xd0] sm:$0xff] }
  0xc2   : > { %v377_v54 = vpop.xlane.xlu1 %376  ;;  %v1214_v55 = vpop.eup %1213  ;;  %v472_v56 = vadd.f32 %v439_v48, %v374_v52  ;;  %765 = vperm.xlu1 %1191, %v1210_v46   ;;  %760 = vperm.xlu0 %1192, %v1212_v51   ;;  %1233 = vpow2.f32 %v1159_v50  ;;  %v448_v52 = vld [vmem:[%s1489_s26 + $0xc8] sm:$0xff] }
  0xc3   : > { %v1216_v58 = vpop.eup %1215  ;;  %v595_v1 = vadd.f32 1.0, %v1214_v55  ;;  %1235 = vpow2.f32 %v1158_v53  ;;  %v473_v12 = vadd.f32 %v440_v3, %v377_v54 }
  0xc4   : > { %v1218_v60 = vpop.eup %1217  ;;  %v1161_v61 = vmul.f32 -1.442695, %v472_v56 }
  0xc5   : > { %v1220_v62 = vpop.eup %1219  ;;  %v598_v63 = vadd.f32 1.0, %v1218_v60  ;;  %v380_v2 = vpop.xlane.xlu0 %379  ;;  %v1162_v24 = vmul.f32 -1.442695, %v473_v12  ;;  %v451_v60 = vld [vmem:[%s1489_s26 + $0xe0] sm:$0xff] }
  0xc6   : > { %v383_v4 = vpop.xlane.xlu1 %382  ;;  %v1222_v5 = vpop.eup %1221  ;;  %v474_v6 = vadd.f32 %v441_v59, %v380_v2  ;;  %770 = vperm.xlu1 %1191, %v1216_v58   ;;  %v596_v13 = vadd.f32 1.0, %v1220_v62  ;;  %v450_v2 = vld [vmem:[%s1489_s26 + $0xd8] sm:$0xff] }
  0xc7   : > { %v1224_v8 = vpop.eup %1223  ;;  %1237 = vrcp.f32 %v598_v63  ;;  %v597_v21 = vadd.f32 1.0, %v1222_v5  ;;  %v475_v25 = vadd.f32 %v442_v16, %v383_v4 }
  0xc8   : > { %v1226_v10 = vpop.eup %1225  ;;  %1239 = vpow2.f32 %v1161_v61  ;;  %v1163_v11 = vmul.f32 -1.442695, %v474_v6 }
  0xc9   : > { %1241 = vrcp.f32 %v595_v1  ;;  %v600_v14 = vadd.f32 1.0, %v1226_v10  ;;  %v386_v15 = vpop.xlane.xlu0 %385  ;;  %v1228_v18 = vpop.eup %1227  ;;  %v1164_v38 = vmul.f32 -1.442695, %v475_v25  ;;  %v453_v10 = vld [vmem:[%s1489_s26 + $0xf0] sm:$0xff] }
  0xca   : > { %v389_v17 = vpop.xlane.xlu1 %388  ;;  %v476_v19 = vadd.f32 %v443_v9, %v386_v15  ;;  %775 = vperm.xlu1 %1191, %v1224_v8   ;;  %1243 = vpow2.f32 %v1160_v7  ;;  %v1230_v20 = vpop.eup %1229 }
  0xcb   : > { %1245 = vrcp.f32 %v600_v14  ;;  %v1232_v26 = vpop.eup %1231  ;;  %v599_v31 = vadd.f32 1.0, %v1230_v20  ;;  %v477_v0 = vadd.f32 %v444_v28, %v389_v17 }
  0xcc   : > { %1247 = vpow2.f32 %v1163_v11  ;;  %v1165_v23 = vmul.f32 -1.442695, %v476_v19  ;;  %v1234_v30 = vpop.eup %1233  ;;  %v452_v19 = vld [vmem:[%s1489_s26 + $0xe8] sm:$0xff] }
  0xcd   : > { %1249 = vrcp.f32 %v596_v13  ;;  %v392_v27 = vpop.xlane.xlu0 %391  ;;  %v1236_v34 = vpop.eup %1235  ;;  %v602_v35 = vadd.f32 1.0, %v1234_v30  ;;  %v1166_v50 = vmul.f32 -1.442695, %v477_v0 }
  0xce   : > { %v395_v29 = vpop.xlane.xlu1 %394  ;;  %1251 = vpow2.f32 %v1165_v23  ;;  %v478_v32 = vadd.f32 %v445_v22, %v392_v27  ;;  %780 = vperm.xlu1 %1191, %v1228_v18   ;;  %v601_v44 = vadd.f32 1.0, %v1236_v34 }
  0xcf   : > { %1253 = vrcp.f32 %v597_v21  ;;  %v479_v51 = vadd.f32 %v446_v41, %v395_v29 }
  0xd0   : > { %v1167_v37 = vmul.f32 -1.442695, %v478_v32  ;;  %1255 = vpow2.f32 %v1162_v24  ;;  %v455_v24 = vld [vmem:[%s1489_s26 + $0x100] sm:$0xff]  ;;  %v454_v32 = vld [vmem:[%s1489_s26 + $0xf8] sm:$0xff] }
  0xd1   : > { %v1238_v39 = vpop.eup %1237  ;;  %1257 = vrcp.f32 %v602_v35  ;;  %v398_v40 = vpop.xlane.xlu0 %397  ;;  %v1168_v1 = vmul.f32 -1.442695, %v479_v51 }
  0xd2   : > { %v401_v42 = vpop.xlane.xlu1 %400  ;;  %v1240_v43 = vpop.eup %1239  ;;  %1259 = vrcp.f32 %v599_v31  ;;  %v480_v33 = vadd.f32 %v447_v36, %v398_v40  ;;  %785 = vperm.xlu1 %1191, %v1232_v26   ;;  %805 = vperm.xlu0 %1192, %v1238_v39  }
  0xd3   : > { %v1242_v45 = vpop.eup %1241  ;;  %v604_v46 = vadd.f32 1.0, %v1240_v43  ;;  %1261 = vpow2.f32 %v1167_v37  ;;  %v481_v61 = vadd.f32 %v448_v52, %v401_v42 }
  0xd4   : > { %v1244_v48 = vpop.eup %1243  ;;  %v1169_v49 = vmul.f32 -1.442695, %v480_v33  ;;  %1263 = vpow2.f32 %v1164_v38 }
  0xd5   : > { %v1246_v53 = vpop.eup %1245  ;;  %1265 = vrcp.f32 %v604_v46  ;;  %v404_v54 = vpop.xlane.xlu0 %403  ;;  %v603_v5 = vadd.f32 1.0, %v1244_v48  ;;  %v1170_v11 = vmul.f32 -1.442695, %v481_v61 }
  0xd6   : > { %v407_v55 = vpop.xlane.xlu1 %406  ;;  %v1248_v56 = vpop.eup %1247  ;;  %1267 = vrcp.f32 %v601_v44  ;;  %v482_v57 = vadd.f32 %v449_v47, %v404_v54  ;;  %790 = vperm.xlu1 %1191, %v1242_v45   ;;  %815 = vperm.xlu0 %1192, %v1246_v53  }
  0xd7   : > { %v1250_v58 = vpop.eup %1249  ;;  %v606_v59 = vadd.f32 1.0, %v1248_v56  ;;  %1269 = vpow2.f32 %v1169_v49  ;;  %v483_v12 = vadd.f32 %v450_v2, %v407_v55 }
  0xd8   : > { %v1252_v62 = vpop.eup %1251  ;;  %v1171_v63 = vmul.f32 -1.442695, %v482_v57  ;;  %1271 = vpow2.f32 %v1166_v50 }
  0xd9   : > { %v1254_v3 = vpop.eup %1253  ;;  %1273 = vrcp.f32 %v606_v59  ;;  %v608_v4 = vadd.f32 1.0, %v1252_v62  ;;  %v410_v6 = vpop.xlane.xlu0 %409  ;;  %v1172_v25 = vmul.f32 -1.442695, %v483_v12 }
  0xda   : > { %v1256_v7 = vpop.eup %1255  ;;  %1275 = vpow2.f32 %v1171_v63  ;;  %v484_v8 = vadd.f32 %v451_v60, %v410_v6  ;;  %795 = vperm.xlu1 %1191, %v1250_v58   ;;  %v413_v13 = vpop.xlane.xlu1 %412 }
  0xdb   : > { %v1258_v9 = vpop.eup %1257  ;;  %1277 = vrcp.f32 %v608_v4  ;;  %v605_v17 = vadd.f32 1.0, %v1256_v7  ;;  %v485_v28 = vadd.f32 %v452_v19, %v413_v13  ;;  %v687_v13 = vld [vmem:[%s1528_s30] sm:$0xff]  ;;  %v692_v19 = vld [vmem:[%s1528_s30 + $0x28] sm:$0xff] }
  0xdc   : > { %v1260_v14 = vpop.eup %1259  ;;  %v1173_v15 = vmul.f32 -1.442695, %v484_v8  ;;  %825 = vperm.xlu0 %1192, %v1258_v9   ;;  %1279 = vpow2.f32 %v1168_v1 }
  0xdd   : > { %v1262_v16 = vpop.eup %1261  ;;  %1281 = vrcp.f32 %v603_v5  ;;  %v416_v18 = vpop.xlane.xlu0 %415  ;;  %v1174_v40 = vmul.f32 -1.442695, %v485_v28  ;;  %v693_v28 = vld [vmem:[%s1528_s30 + $0x30] sm:$0xff] }
  0xde   : > { %v1264_v20 = vpop.eup %1263  ;;  %v610_v21 = vadd.f32 1.0, %v1262_v16  ;;  %1283 = vpow2.f32 %v1173_v15  ;;  %v486_v22 = vadd.f32 %v453_v10, %v416_v18  ;;  %800 = vperm.xlu1 %1191, %v1254_v3   ;;  %v419_v34 = vpop.xlane.xlu1 %418  ;;  %v691_v18 = vld [vmem:[%s1528_s30 + $0x20] sm:$0xff] }
  0xdf   : > { %v1266_v23 = vpop.eup %1265  ;;  %1285 = vpow2.f32 %v1170_v11  ;;  %v607_v30 = vadd.f32 1.0, %v1264_v20  ;;  %v487_v41 = vadd.f32 %v454_v32, %v419_v34  ;;  %v689_v20 = vld [vmem:[%s1528_s30 + $0x10] sm:$0xff]  ;;  %v695_v34 = vld [vmem:[%s1528_s30 + $0x40] sm:$0xff] }
  0xe0   : > { %v1268_v26 = vpop.eup %1267  ;;  %1287 = vrcp.f32 %v610_v21  ;;  %v1175_v27 = vmul.f32 -1.442695, %v486_v22  ;;  %835 = vperm.xlu0 %1192, %v1266_v23   ;;  %v690_v21 = vld [vmem:[%s1528_s30 + $0x18] sm:$0xff] }
  0xe1   : > { %v1270_v29 = vpop.eup %1269  ;;  %1289 = vrcp.f32 %v605_v17  ;;  %v422_v31 = vpop.xlane.xlu0 %421  ;;  %v1176_v47 = vmul.f32 -1.442695, %v487_v41 }
  0xe2   : > { %v1272_v35 = vpop.eup %1271  ;;  %v612_v36 = vadd.f32 1.0, %v1270_v29  ;;  %1291 = vpow2.f32 %v1175_v27  ;;  %v488_v37 = vadd.f32 %v455_v24, %v422_v31  ;;  %810 = vperm.xlu1 %1191, %v1260_v14   ;;  %v688_v14 = vld [vmem:[%s1528_s30 + $0x8] sm:$0xff]  ;;  %v694_v29 = vld [vmem:[%s1528_s30 + $0x38] sm:$0xff] }
  0xe3   : > { %v1274_v38 = vpop.eup %1273  ;;  %1293 = vpow2.f32 %v1172_v25  ;;  %v609_v44 = vadd.f32 1.0, %v1272_v35  ;;  %v696_v35 = vld [vmem:[%s1528_s30 + $0x48] sm:$0xff] }
  0xe4   : > { %v1276_v0 = vpop.eup %1275  ;;  %1295 = vrcp.f32 %v612_v36  ;;  %v1177_v39 = vmul.f32 -1.442695, %v488_v37  ;;  %845 = vperm.xlu0 %1192, %v1274_v38  }
  0xe5   : > { %v1278_v42 = vpop.eup %1277  ;;  %1297 = vrcp.f32 %v607_v30  ;;  %v614_v43 = vadd.f32 1.0, %v1276_v0  ;;  %v697_v0 = vld [vmem:[%s1528_s30 + $0x50] sm:$0xff] }
  0xe6   : > { %v1280_v33 = vpop.eup %1279  ;;  %1299 = vpow2.f32 %v1177_v39  ;;  %820 = vperm.xlu1 %1191, %v1268_v26   ;;  %v698_v39 = vld [vmem:[%s1528_s30 + $0x58] sm:$0xff] }
  0xe7   : > { %v1282_v45 = vpop.eup %1281  ;;  %1301 = vrcp.f32 %v614_v43  ;;  %v611_v50 = vadd.f32 1.0, %v1280_v33  ;;  %v699_v43 = vld [vmem:[%s1528_s30 + $0x60] sm:$0xff] }
  0xe8   : > { %v1284_v46 = vpop.eup %1283  ;;  %855 = vperm.xlu0 %1192, %v1278_v42   ;;  %1303 = vpow2.f32 %v1174_v40  ;;  %v707_v33 = vld [vmem:[%s1528_s30 + $0xa0] sm:$0xff] }
  0xe9   : > { %v1286_v48 = vpop.eup %1285  ;;  %1305 = vrcp.f32 %v609_v44  ;;  %v616_v49 = vadd.f32 1.0, %v1284_v46  ;;  %v700_v44 = vld [vmem:[%s1528_s30 + $0x68] sm:$0xff] }
  0xea   : > { %v1288_v51 = vpop.eup %1287  ;;  %830 = vperm.xlu1 %1191, %v1282_v45   ;;  %v613_v56 = vadd.f32 1.0, %v1286_v48  ;;  %v708_v45 = vld [vmem:[%s1528_s30 + $0xa8] sm:$0xff] }
  0xeb   : > { %v1290_v52 = vpop.eup %1289  ;;  %1307 = vrcp.f32 %v616_v49 }
  0xec   : > { %v1292_v53 = vpop.eup %1291  ;;  %865 = vperm.xlu0 %1192, %v1288_v51   ;;  %1309 = vpow2.f32 %v1176_v47 }
  0xed   : > { %v1294_v54 = vpop.eup %1293  ;;  %1311 = vrcp.f32 %v611_v50  ;;  %v618_v55 = vadd.f32 1.0, %v1292_v53  ;;  %v702_v53 = vld [vmem:[%s1528_s30 + $0x78] sm:$0xff] }
  0xee   : > { %v1296_v57 = vpop.eup %1295  ;;  %840 = vperm.xlu1 %1191, %v1290_v52   ;;  %v615_v62 = vadd.f32 1.0, %v1294_v54  ;;  %v701_v52 = vld [vmem:[%s1528_s30 + $0x70] sm:$0xff]  ;;  %v711_v54 = vld [vmem:[%s1528_s30 + $0xc0] sm:$0xff] }
  0xef   : > { %v1298_v58 = vpop.eup %1297  ;;  %1313 = vrcp.f32 %v618_v55  ;;  %v712_v55 = vld [vmem:[%s1528_s30 + $0xc8] sm:$0xff] }
  0xf0   : > { %v1300_v59 = vpop.eup %1299  ;;  %875 = vperm.xlu0 %1192, %v1296_v57   ;;  %1315 = vrcp.f32 %v613_v56 }
  0xf1   : > { %v1302_v60 = vpop.eup %1301  ;;  %v620_v61 = vadd.f32 1.0, %v1300_v59 }
  0xf2   : > { %v1304_v63 = vpop.eup %1303  ;;  %850 = vperm.xlu1 %1191, %v1298_v58  }
  0xf3   : > { %v1306_v1 = vpop.eup %1305  ;;  %1317 = vrcp.f32 %v620_v61  ;;  %v617_v3 = vadd.f32 1.0, %v1304_v63  ;;  %v704_v63 = vld [vmem:[%s1528_s30 + $0x88] sm:$0xff] }
  0xf4   : > { %885 = vperm.xlu0 %1192, %v1302_v60   ;;  %1319 = vrcp.f32 %v615_v62  ;;  %v703_v62 = vld [vmem:[%s1528_s30 + $0x80] sm:$0xff] }
  0xf5   : > { %v1308_v2 = vpop.eup %1307  ;;  %1321 = vrcp.f32 %v617_v3  ;;  %v716_v3 = vld [vmem:[%s1528_s30 + $0xe8] sm:$0xff] }
  0xf6   : > { %v1310_v4 = vpop.eup %1309  ;;  %860 = vperm.xlu1 %1191, %v1306_v1  }
  0xf7   : > { %v1312_v5 = vpop.eup %1311  ;;  %v619_v7 = vadd.f32 1.0, %v1310_v4 }
  0xf8   : > { %895 = vperm.xlu0 %1192, %v1308_v2   ;;  %v715_v2 = vld [vmem:[%s1528_s30 + $0xe0] sm:$0xff] }
  0xf9   : > { %v1314_v6 = vpop.eup %1313  ;;  %1323 = vrcp.f32 %v619_v7  ;;  %v705_v7 = vld [vmem:[%s1528_s30 + $0x90] sm:$0xff] }
  0xfa   : > { %870 = vperm.xlu1 %1191, %v1312_v5   ;;  %v1316_v8 = vpop.eup %1315 }
  0xfc   : > { %905 = vperm.xlu0 %1192, %v1314_v6  }
  0xfd   : > { %v1318_v9 = vpop.eup %1317 }
  0xfe   : > { %880 = vperm.xlu1 %1191, %v1316_v8   ;;  %v1320_v10 = vpop.eup %1319  ;;  %v706_v8 = vld [vmem:[%s1528_s30 + $0x98] sm:$0xff] }
  0xff   : > { %v1322_v11 = vpop.eup %1321 }
 0x100   : > { %915 = vperm.xlu0 %1192, %v1318_v9  }
 0x102   : > { %890 = vperm.xlu1 %1191, %v1320_v10  }
 0x103   : > { %v1324_v12 = vpop.eup %1323 }
 0x106   : > { %900 = vperm.xlu1 %1191, %v1322_v11  }
 0x10a   : > { %910 = vperm.xlu1 %1191, %v1324_v12   ;;  %v719_v12 = vld [vmem:[%s1528_s30 + $0x100] sm:$0xff] }
 0x13d   : > { %v756_v15 = vpop.permute.xlu1 %755 }
 0x13e   : > { %v918_v16 = vmul.f32 %v756_v15, %v687_v13  ;;  %v919_v17 = vmul.f32 %v756_v15, %v688_v14  ;;  %v720_v13 = vld [vmem:[%s1528_s30 + $0x108] sm:$0xff] }
 0x140   : > { %984 = vst [vmem:[%s1535_s7] sm:$0xff] %v918_v16  ;;  %986 = vst.msk [vmem:[%s1535_s7 + $0x8] sm:$0xff] %vm985_vm1, %v919_v17  ;;  %v709_v17 = vld [vmem:[%s1528_s30 + $0xb0] sm:$0xff] }
 0x141   : > { %v766_v22 = vpop.permute.xlu1 %765  ;;  %v761_v23 = vpop.permute.xlu0 %760 }
 0x142   : > { %v922_v24 = vmul.f32 %v766_v22, %v691_v18  ;;  %v923_v25 = vmul.f32 %v766_v22, %v692_v19  ;;  %v920_v26 = vmul.f32 %v761_v23, %v689_v20  ;;  %v921_v27 = vmul.f32 %v761_v23, %v690_v21  ;;  %v710_v18 = vld [vmem:[%s1528_s30 + $0xb8] sm:$0xff]  ;;  %v723_v22 = vld [vmem:[%s1528_s30 + $0x120] sm:$0xff]  ;;  %v724_v23 = vld [vmem:[%s1528_s30 + $0x128] sm:$0xff] }
 0x144   : > { %989 = vst [vmem:[%s1535_s7 + $0x20] sm:$0xff] %v922_v24  ;;  %990 = vst.msk [vmem:[%s1535_s7 + $0x28] sm:$0xff] %vm985_vm1, %v923_v25 }
 0x145   : > { %987 = vst [vmem:[%s1535_s7 + $0x10] sm:$0xff] %v920_v26  ;;  %988 = vst.msk [vmem:[%s1535_s7 + $0x18] sm:$0xff] %vm985_vm1, %v921_v27  ;;  %v771_v30 = vpop.permute.xlu1 %770  ;;  %v713_v27 = vld [vmem:[%s1528_s30 + $0xd0] sm:$0xff] }
 0x146   : > { %v924_v31 = vmul.f32 %v771_v30, %v693_v28  ;;  %v925_v32 = vmul.f32 %v771_v30, %v694_v29  ;;  %v714_v28 = vld [vmem:[%s1528_s30 + $0xd8] sm:$0xff] }
 0x148   : > { %991 = vst [vmem:[%s1535_s7 + $0x30] sm:$0xff] %v924_v31  ;;  %992 = vst.msk [vmem:[%s1535_s7 + $0x38] sm:$0xff] %vm985_vm1, %v925_v32  ;;  %v727_v32 = vld [vmem:[%s1528_s30 + $0x140] sm:$0xff] }
 0x149   : > { %v776_v36 = vpop.permute.xlu1 %775 }
 0x14a   : > { %v926_v37 = vmul.f32 %v776_v36, %v695_v34  ;;  %v927_v38 = vmul.f32 %v776_v36, %v696_v35  ;;  %v728_v34 = vld [vmem:[%s1528_s30 + $0x148] sm:$0xff] }
 0x14c   : > { %993 = vst [vmem:[%s1535_s7 + $0x40] sm:$0xff] %v926_v37  ;;  %994 = vst.msk [vmem:[%s1535_s7 + $0x48] sm:$0xff] %vm985_vm1, %v927_v38  ;;  %v717_v38 = vld [vmem:[%s1528_s30 + $0xf0] sm:$0xff] }
 0x14d   : > { %v781_v40 = vpop.permute.xlu1 %780 }
 0x14e   : > { %v928_v41 = vmul.f32 %v781_v40, %v697_v0  ;;  %v929_v42 = vmul.f32 %v781_v40, %v698_v39  ;;  %v718_v0 = vld [vmem:[%s1528_s30 + $0xf8] sm:$0xff] }
 0x150   : > { %995 = vst [vmem:[%s1535_s7 + $0x50] sm:$0xff] %v928_v41  ;;  %996 = vst.msk [vmem:[%s1535_s7 + $0x58] sm:$0xff] %vm985_vm1, %v929_v42  ;;  %v731_v42 = vld [vmem:[%s1528_s30 + $0x160] sm:$0xff] }
 0x151   : > { %v786_v46 = vpop.permute.xlu1 %785  ;;  %v806_v47 = vpop.permute.xlu0 %805 }
 0x152   : > { %v930_v48 = vmul.f32 %v786_v46, %v699_v43  ;;  %v931_v49 = vmul.f32 %v786_v46, %v700_v44  ;;  %v938_v50 = vmul.f32 %v806_v47, %v707_v33  ;;  %v939_v51 = vmul.f32 %v806_v47, %v708_v45  ;;  %v732_v43 = vld [vmem:[%s1528_s30 + $0x168] sm:$0xff]  ;;  %v721_v46 = vld [vmem:[%s1528_s30 + $0x110] sm:$0xff]  ;;  %v722_v47 = vld [vmem:[%s1528_s30 + $0x118] sm:$0xff] }
 0x154   : > { %997 = vst [vmem:[%s1535_s7 + $0x60] sm:$0xff] %v930_v48  ;;  %998 = vst.msk [vmem:[%s1535_s7 + $0x68] sm:$0xff] %vm985_vm1, %v931_v49 }
 0x155   : > { %1005 = vst [vmem:[%s1535_s7 + $0xa0] sm:$0xff] %v938_v50  ;;  %1006 = vst.msk [vmem:[%s1535_s7 + $0xa8] sm:$0xff] %vm985_vm1, %v939_v51  ;;  %v791_v56 = vpop.permute.xlu1 %790  ;;  %v816_v57 = vpop.permute.xlu0 %815  ;;  %v735_v51 = vld [vmem:[%s1528_s30 + $0x180] sm:$0xff] }
 0x156   : > { %v932_v58 = vmul.f32 %v791_v56, %v701_v52  ;;  %v933_v59 = vmul.f32 %v791_v56, %v702_v53  ;;  %v942_v60 = vmul.f32 %v816_v57, %v711_v54  ;;  %v943_v61 = vmul.f32 %v816_v57, %v712_v55  ;;  %v736_v52 = vld [vmem:[%s1528_s30 + $0x188] sm:$0xff]  ;;  %v725_v56 = vld [vmem:[%s1528_s30 + $0x130] sm:$0xff]  ;;  %v726_v57 = vld [vmem:[%s1528_s30 + $0x138] sm:$0xff] }
 0x158   : > { %999 = vst [vmem:[%s1535_s7 + $0x70] sm:$0xff] %v932_v58  ;;  %1000 = vst.msk [vmem:[%s1535_s7 + $0x78] sm:$0xff] %vm985_vm1, %v933_v59 }
 0x159   : > { %1009 = vst [vmem:[%s1535_s7 + $0xc0] sm:$0xff] %v942_v60  ;;  %1010 = vst.msk [vmem:[%s1535_s7 + $0xc8] sm:$0xff] %vm985_vm1, %v943_v61  ;;  %v796_v1 = vpop.permute.xlu1 %795  ;;  %v739_v61 = vld [vmem:[%s1528_s30 + $0x1a0] sm:$0xff] }
 0x15a   : > { %v934_v4 = vmul.f32 %v796_v1, %v703_v62  ;;  %v935_v5 = vmul.f32 %v796_v1, %v704_v63  ;;  %v740_v62 = vld [vmem:[%s1528_s30 + $0x1a8] sm:$0xff] }
 0x15b   : > { %v826_v6 = vpop.permute.xlu0 %825 }
 0x15c   : > { %1001 = vst [vmem:[%s1535_s7 + $0x80] sm:$0xff] %v934_v4  ;;  %1002 = vst.msk [vmem:[%s1535_s7 + $0x88] sm:$0xff] %vm985_vm1, %v935_v5  ;;  %v946_v9 = vmul.f32 %v826_v6, %v715_v2  ;;  %v947_v10 = vmul.f32 %v826_v6, %v716_v3  ;;  %v729_v3 = vld [vmem:[%s1528_s30 + $0x150] sm:$0xff]  ;;  %v730_v4 = vld [vmem:[%s1528_s30 + $0x158] sm:$0xff] }
 0x15d   : > { %v801_v11 = vpop.permute.xlu1 %800 }
 0x15e   : > { %1013 = vst [vmem:[%s1535_s7 + $0xe0] sm:$0xff] %v946_v9  ;;  %1014 = vst.msk [vmem:[%s1535_s7 + $0xe8] sm:$0xff] %vm985_vm1, %v947_v10  ;;  %v936_v14 = vmul.f32 %v801_v11, %v705_v7  ;;  %v937_v15 = vmul.f32 %v801_v11, %v706_v8  ;;  %v743_v8 = vld [vmem:[%s1528_s30 + $0x1c0] sm:$0xff]  ;;  %v744_v9 = vld [vmem:[%s1528_s30 + $0x1c8] sm:$0xff] }
 0x15f   : > { %v836_v16 = vpop.permute.xlu0 %835 }
 0x160   : > { %1003 = vst [vmem:[%s1535_s7 + $0x90] sm:$0xff] %v936_v14  ;;  %1004 = vst.msk [vmem:[%s1535_s7 + $0x98] sm:$0xff] %vm985_vm1, %v937_v15  ;;  %v950_v19 = vmul.f32 %v836_v16, %v719_v12  ;;  %v951_v20 = vmul.f32 %v836_v16, %v720_v13  ;;  %v733_v13 = vld [vmem:[%s1528_s30 + $0x170] sm:$0xff]  ;;  %v734_v14 = vld [vmem:[%s1528_s30 + $0x178] sm:$0xff] }
 0x161   : > { %v811_v21 = vpop.permute.xlu1 %810 }
 0x162   : > { %1017 = vst [vmem:[%s1535_s7 + $0x100] sm:$0xff] %v950_v19  ;;  %1018 = vst.msk [vmem:[%s1535_s7 + $0x108] sm:$0xff] %vm985_vm1, %v951_v20  ;;  %v940_v24 = vmul.f32 %v811_v21, %v709_v17  ;;  %v941_v25 = vmul.f32 %v811_v21, %v710_v18  ;;  %v747_v18 = vld [vmem:[%s1528_s30 + $0x1e0] sm:$0xff]  ;;  %v748_v19 = vld [vmem:[%s1528_s30 + $0x1e8] sm:$0xff] }
 0x163   : > { %v846_v26 = vpop.permute.xlu0 %845 }
 0x164   : > { %1007 = vst [vmem:[%s1535_s7 + $0xb0] sm:$0xff] %v940_v24  ;;  %1008 = vst.msk [vmem:[%s1535_s7 + $0xb8] sm:$0xff] %vm985_vm1, %v941_v25  ;;  %v954_v29 = vmul.f32 %v846_v26, %v723_v22  ;;  %v955_v30 = vmul.f32 %v846_v26, %v724_v23  ;;  %v737_v23 = vld [vmem:[%s1528_s30 + $0x190] sm:$0xff]  ;;  %v738_v24 = vld [vmem:[%s1528_s30 + $0x198] sm:$0xff] }
 0x165   : > { %v821_v31 = vpop.permute.xlu1 %820 }
 0x166   : > { %1021 = vst [vmem:[%s1535_s7 + $0x120] sm:$0xff] %v954_v29  ;;  %1022 = vst.msk [vmem:[%s1535_s7 + $0x128] sm:$0xff] %vm985_vm1, %v955_v30  ;;  %v944_v35 = vmul.f32 %v821_v31, %v713_v27  ;;  %v945_v36 = vmul.f32 %v821_v31, %v714_v28  ;;  %v751_v28 = vld [vmem:[%s1528_s30 + $0x200] sm:$0xff]  ;;  %v752_v29 = vld [vmem:[%s1528_s30 + $0x208] sm:$0xff] }
 0x167   : > { %v856_v37 = vpop.permute.xlu0 %855 }
 0x168   : > { %1011 = vst [vmem:[%s1535_s7 + $0xd0] sm:$0xff] %v944_v35  ;;  %1012 = vst.msk [vmem:[%s1535_s7 + $0xd8] sm:$0xff] %vm985_vm1, %v945_v36  ;;  %v958_v39 = vmul.f32 %v856_v37, %v727_v32  ;;  %v959_v40 = vmul.f32 %v856_v37, %v728_v34  ;;  %v741_v34 = vld [vmem:[%s1528_s30 + $0x1b0] sm:$0xff]  ;;  %v742_v35 = vld [vmem:[%s1528_s30 + $0x1b8] sm:$0xff] }
 0x169   : > { %v831_v41 = vpop.permute.xlu1 %830 }
 0x16a   : > { %1025 = vst [vmem:[%s1535_s7 + $0x140] sm:$0xff] %v958_v39  ;;  %1026 = vst.msk [vmem:[%s1535_s7 + $0x148] sm:$0xff] %vm985_vm1, %v959_v40  ;;  %v948_v44 = vmul.f32 %v831_v41, %v717_v38  ;;  %v949_v33 = vmul.f32 %v831_v41, %v718_v0  ;;  %v745_v40 = vld [vmem:[%s1528_s30 + $0x1d0] sm:$0xff]  ;;  %v746_v41 = vld [vmem:[%s1528_s30 + $0x1d8] sm:$0xff] }
 0x16b   : > { %v866_v45 = vpop.permute.xlu0 %865 }
 0x16c   : > { %1015 = vst [vmem:[%s1535_s7 + $0xf0] sm:$0xff] %v948_v44  ;;  %1016 = vst.msk [vmem:[%s1535_s7 + $0xf8] sm:$0xff] %vm985_vm1, %v949_v33  ;;  %v962_v48 = vmul.f32 %v866_v45, %v731_v42  ;;  %v963_v49 = vmul.f32 %v866_v45, %v732_v43  ;;  %v749_v33 = vld [vmem:[%s1528_s30 + $0x1f0] sm:$0xff]  ;;  %v750_v45 = vld [vmem:[%s1528_s30 + $0x1f8] sm:$0xff] }
 0x16d   : > { %v841_v50 = vpop.permute.xlu1 %840 }
 0x16e   : > { %1029 = vst [vmem:[%s1535_s7 + $0x160] sm:$0xff] %v962_v48  ;;  %1030 = vst.msk [vmem:[%s1535_s7 + $0x168] sm:$0xff] %vm985_vm1, %v963_v49  ;;  %v952_v53 = vmul.f32 %v841_v50, %v721_v46  ;;  %v953_v54 = vmul.f32 %v841_v50, %v722_v47 }
 0x16f   : > { %v876_v55 = vpop.permute.xlu0 %875 }
 0x170   : > { %1019 = vst [vmem:[%s1535_s7 + $0x110] sm:$0xff] %v952_v53  ;;  %1020 = vst.msk [vmem:[%s1535_s7 + $0x118] sm:$0xff] %vm985_vm1, %v953_v54  ;;  %v966_v58 = vmul.f32 %v876_v55, %v735_v51  ;;  %v967_v59 = vmul.f32 %v876_v55, %v736_v52 }
 0x171   : > { %v851_v60 = vpop.permute.xlu1 %850 }
 0x172   : > { %1033 = vst [vmem:[%s1535_s7 + $0x180] sm:$0xff] %v966_v58  ;;  %1034 = vst.msk [vmem:[%s1535_s7 + $0x188] sm:$0xff] %vm985_vm1, %v967_v59  ;;  %v956_v63 = vmul.f32 %v851_v60, %v725_v56  ;;  %v957_v1 = vmul.f32 %v851_v60, %v726_v57 }
 0x173   : > { %v886_v2 = vpop.permute.xlu0 %885 }
 0x174   : > { %1023 = vst [vmem:[%s1535_s7 + $0x130] sm:$0xff] %v956_v63  ;;  %1024 = vst.msk [vmem:[%s1535_s7 + $0x138] sm:$0xff] %vm985_vm1, %v957_v1  ;;  %v970_v5 = vmul.f32 %v886_v2, %v739_v61  ;;  %v971_v6 = vmul.f32 %v886_v2, %v740_v62 }
 0x175   : > { %v861_v7 = vpop.permute.xlu1 %860 }
 0x176   : > { %1037 = vst [vmem:[%s1535_s7 + $0x1a0] sm:$0xff] %v970_v5  ;;  %1038 = vst.msk [vmem:[%s1535_s7 + $0x1a8] sm:$0xff] %vm985_vm1, %v971_v6  ;;  %v960_v10 = vmul.f32 %v861_v7, %v729_v3  ;;  %v961_v11 = vmul.f32 %v861_v7, %v730_v4 }
 0x177   : > { %v896_v12 = vpop.permute.xlu0 %895 }
 0x178   : > { %1027 = vst [vmem:[%s1535_s7 + $0x150] sm:$0xff] %v960_v10  ;;  %1028 = vst.msk [vmem:[%s1535_s7 + $0x158] sm:$0xff] %vm985_vm1, %v961_v11  ;;  %v974_v15 = vmul.f32 %v896_v12, %v743_v8  ;;  %v975_v16 = vmul.f32 %v896_v12, %v744_v9 }
 0x179   : > { %v871_v17 = vpop.permute.xlu1 %870 }
 0x17a   : > { %1041 = vst [vmem:[%s1535_s7 + $0x1c0] sm:$0xff] %v974_v15  ;;  %1042 = vst.msk [vmem:[%s1535_s7 + $0x1c8] sm:$0xff] %vm985_vm1, %v975_v16  ;;  %v964_v20 = vmul.f32 %v871_v17, %v733_v13  ;;  %v965_v21 = vmul.f32 %v871_v17, %v734_v14 }
 0x17b   : > { %v906_v22 = vpop.permute.xlu0 %905 }
 0x17c   : > { %1031 = vst [vmem:[%s1535_s7 + $0x170] sm:$0xff] %v964_v20  ;;  %1032 = vst.msk [vmem:[%s1535_s7 + $0x178] sm:$0xff] %vm985_vm1, %v965_v21  ;;  %v978_v25 = vmul.f32 %v906_v22, %v747_v18  ;;  %v979_v26 = vmul.f32 %v906_v22, %v748_v19 }
 0x17d   : > { %v881_v27 = vpop.permute.xlu1 %880 }
 0x17e   : > { %1045 = vst [vmem:[%s1535_s7 + $0x1e0] sm:$0xff] %v978_v25  ;;  %1046 = vst.msk [vmem:[%s1535_s7 + $0x1e8] sm:$0xff] %vm985_vm1, %v979_v26  ;;  %v968_v30 = vmul.f32 %v881_v27, %v737_v23  ;;  %v969_v31 = vmul.f32 %v881_v27, %v738_v24 }
 0x17f   : > { %v916_v32 = vpop.permute.xlu0 %915 }
 0x180   : > { %1035 = vst [vmem:[%s1535_s7 + $0x190] sm:$0xff] %v968_v30  ;;  %1036 = vst.msk [vmem:[%s1535_s7 + $0x198] sm:$0xff] %vm985_vm1, %v969_v31  ;;  %v982_v36 = vmul.f32 %v916_v32, %v751_v28  ;;  %v983_v37 = vmul.f32 %v916_v32, %v752_v29 }
 0x181   : > { %v891_v38 = vpop.permute.xlu1 %890 }
 0x182   : > { %1049 = vst [vmem:[%s1535_s7 + $0x200] sm:$0xff] %v982_v36  ;;  %1050 = vst.msk [vmem:[%s1535_s7 + $0x208] sm:$0xff] %vm985_vm1, %v983_v37  ;;  %v972_v0 = vmul.f32 %v891_v38, %v741_v34  ;;  %v973_v39 = vmul.f32 %v891_v38, %v742_v35 }
 0x184   : > { %1039 = vst [vmem:[%s1535_s7 + $0x1b0] sm:$0xff] %v972_v0  ;;  %1040 = vst.msk [vmem:[%s1535_s7 + $0x1b8] sm:$0xff] %vm985_vm1, %v973_v39 }
 0x185   : > { %v901_v42 = vpop.permute.xlu1 %900 }
 0x186   : > { %v976_v43 = vmul.f32 %v901_v42, %v745_v40  ;;  %v977_v44 = vmul.f32 %v901_v42, %v746_v41 }
 0x188   : > { %1043 = vst [vmem:[%s1535_s7 + $0x1d0] sm:$0xff] %v976_v43  ;;  %1044 = vst.msk [vmem:[%s1535_s7 + $0x1d8] sm:$0xff] %vm985_vm1, %v977_v44 }
 0x189   : > { %v911_v46 = vpop.permute.xlu1 %910 }
 0x18a   : > { %v980_v47 = vmul.f32 %v911_v46, %v749_v33  ;;  %v981_v48 = vmul.f32 %v911_v46, %v750_v45 }
 0x18c   : > { %1047 = vst [vmem:[%s1535_s7 + $0x1f0] sm:$0xff] %v980_v47  ;;  %1048 = vst.msk [vmem:[%s1535_s7 + $0x1f8] sm:$0xff] %vm985_vm1, %v981_v48 }
 0x18d PF: > { %s14_s15 = sadd.s32 1, %s1331_s15  }
 0x18e   : > { %p11_p4 = scmp.ge.s32.totalorder %s14_s15, 4  }
 0x190   :  { %13 = sbr.rel (!%p11_p4) target bundleno = 1 (0x1), region = 72 }

</bundles_post_ra>
